<compile_context>
chip_gen: v7x
topology: tpu7x:2x2x1
jax: 0.10.0
libtpu: 0.0.40
codegen_flags: <defaults>
</compile_context>

<pallas_src>
import functools

import jax
import jax.numpy as jnp
from jax import lax
from jax.experimental import pallas as pl
from jax.experimental.pallas import tpu as pltpu


def _mtl_kernel(x_ref, w_ref, b_ref, tgt_ref, out_ref, *,
                lp, l_real, s_width, alpha_fl, gamma_fl):
    m, _ = x_ref.shape
    bb = m // lp

    # One fused MXU matmul: bf16 operands, f32 accumulation.
    r2 = jnp.dot(x_ref[...], w_ref[...],
                 preferred_element_type=jnp.float32)        # (bb*Lp, 2S)
    r = r2.reshape(bb, lp, 2 * s_width)
    s = r[:, :, :s_width]        # attention scores   (lane-tile aligned slice)
    z = r[:, :, s_width:]        # per-token final-layer projections

    if lp != l_real:             # static branch: mask padded sequence rows
        row = lax.broadcasted_iota(jnp.int32, (bb, lp, s_width), 1)
        s = jnp.where(row < l_real, s, -jnp.inf)

    # Softmax over the sequence axis (f32 elementwise, denominator on EUP).
    s = s - jnp.max(s, axis=1, keepdims=True)
    e = jnp.exp(s)
    a = e * pl.reciprocal(jnp.sum(e, axis=1, keepdims=True), approx=True)

    # y[b,j] = sum_l alpha[b,l,j] * z[b,l,j] + bias[j]
    #        == (final_w * (alpha @ x)).sum(-1) + bias   (sum reordering)
    y = jnp.sum(a * z, axis=1) + b_ref[...]                 # (bb, S)

    # Focal loss terms via numerically stable BCE-with-logits.
    t = tgt_ref[...]
    bce = jnp.maximum(y, 0.0) - y * t + jnp.log1p(jnp.exp(-jnp.abs(y)))
    pt = jnp.exp(-bce)
    d = 1.0 - pt
    if float(gamma_fl).is_integer():                         # static VPU chain
        w = jnp.ones_like(d)
        for _ in range(int(gamma_fl)):
            w = w * d
    else:                                                    # non-integer gamma
        w = jnp.power(d, gamma_fl)
    foc = alpha_fl * w * bce

    # Lane-dense stores (both segments start at 128-lane multiples).
    out_ref[:, :s_width] = y
    out_ref[:, s_width:] = foc


def output_layer_mtl_forward(x, target, target_ccs, params, *,
                             focal_alpha=1.0, focal_gamma=2.0):
    """x: (B, L, F) features, target: (B, Y), target_ccs: (B, Y_ccs)."""
    B, L, F = x.shape
    Y = params["U_w"].shape[0]
    Yc = params["U_ccs_w"].shape[0]

    # Label dims padded to 128-lane multiples (lane-dense matmul N and stores).
    PY = pl.cdiv(Y, 128) * 128
    PC = pl.cdiv(Yc, 128) * 128
    S = PY + PC                                  # width of scores / projections

    # Sequence dim padded to a multiple of 8 (sublane rule on the matmul M dim).
    Lp = pl.cdiv(L, 8) * 8

    # Batch block: ~4 MiB of bf16 x per grid step; whole batch when smaller.
    row_bytes = Lp * F * 2
    bb = max(1, min(B, (4 << 20) // max(row_bytes, 1)))
    if bb < B:
        bb = max(8, (bb // 8) * 8)
    nb = pl.cdiv(B, bb)
    Bp = nb * bb

    # Fused, pre-transposed (F, 2S) weight: [U | U_ccs | final | final_ccs].
    Wcat = jnp.zeros((F, 2 * S), jnp.float32)
    Wcat = Wcat.at[:, 0:Y].set(params["U_w"].T)
    Wcat = Wcat.at[:, PY:PY + Yc].set(params["U_ccs_w"].T)
    Wcat = Wcat.at[:, S:S + Y].set(params["final_w"].T)
    Wcat = Wcat.at[:, S + PY:S + PY + Yc].set(params["final_ccs_w"].T)
    Wcat = Wcat.astype(jnp.bfloat16)

    bcat = jnp.zeros((1, S), jnp.float32)
    bcat = bcat.at[0, 0:Y].set(params["final_b"].astype(jnp.float32))
    bcat = bcat.at[0, PY:PY + Yc].set(params["final_ccs_b"].astype(jnp.float32))

    tcat = jnp.zeros((Bp, S), jnp.float32)
    tcat = tcat.at[:B, 0:Y].set(target.astype(jnp.float32))
    tcat = tcat.at[:B, PY:PY + Yc].set(target_ccs.astype(jnp.float32))

    # x: pad batch/seq, cast to bf16 in the wrapper, flatten to (Bp*Lp, F).
    xp = jnp.pad(x, ((0, Bp - B), (0, Lp - L), (0, 0))).astype(jnp.bfloat16)
    x2 = xp.reshape(Bp * Lp, F)

    kernel = functools.partial(_mtl_kernel, lp=Lp, l_real=L, s_width=S,
                               alpha_fl=float(focal_alpha),
                               gamma_fl=float(focal_gamma))

    flops = 2 * Bp * Lp * F * (2 * S) + 8 * Bp * Lp * S
    transcendentals = Bp * Lp * S + 3 * Bp * S
    bytes_accessed = (Bp * Lp * F * 2 + F * 2 * S * 2 + Bp * S * 4
                      + Bp * 2 * S * 4 + S * 4)

    blk = 2 * (bb * Lp * F * 2 + bb * S * 4 + bb * 2 * S * 4) + F * 2 * S * 2
    vmem_limit = int(max(32 << 20, min(2 * blk + (8 << 20), 64 << 20)))

    slab = pl.pallas_call(
        kernel,
        out_shape=jax.ShapeDtypeStruct((Bp, 2 * S), jnp.float32),
        grid=(nb,),
        in_specs=[
            pl.BlockSpec((bb * Lp, F), lambda i: (i, 0)),   # x (bf16, flattened)
            pl.BlockSpec((F, 2 * S), lambda i: (0, 0)),     # fused weight (bf16)
            pl.BlockSpec((1, S), lambda i: (0, 0)),         # fused bias
            pl.BlockSpec((bb, S), lambda i: (i, 0)),        # fused targets
        ],
        out_specs=pl.BlockSpec((bb, 2 * S), lambda i: (i, 0)),
        compiler_params=pltpu.CompilerParams(
            dimension_semantics=("parallel",),              # v7x dual-TC friendly
            vmem_limit_bytes=vmem_limit),
        cost_estimate=pl.CostEstimate(flops=int(flops),
                                      transcendentals=int(transcendentals),
                                      bytes_accessed=int(bytes_accessed)),
    )(x2, Wcat, bcat, tcat)

    y = slab[:B, 0:Y]
    y_ccs = slab[:B, PY:PY + Yc]
    loss = jnp.mean(slab[:B, S:S + Y])                      # FocalLoss(reduce=True)
    loss_ccs = jnp.mean(slab[:B, S + PY:S + PY + Yc])
    return y, y_ccs, loss, loss_ccs


def reference_forward(x, target, target_ccs, params, *,
                      focal_alpha=1.0, focal_gamma=2.0):
    """Pure-JAX reference mirroring the PyTorch module (f32 everywhere)."""
    def head(u, fw, fb):
        att = jnp.einsum('yf,blf->byl', u, x)
        alpha = jax.nn.softmax(att, axis=2)
        m = jnp.einsum('byl,blf->byf', alpha, x)
        return jnp.sum(fw[None] * m, axis=-1) + fb

    def focal_loss(yy, t):
        bce = jnp.maximum(yy, 0.0) - yy * t + jnp.log1p(jnp.exp(-jnp.abs(yy)))
        pt = jnp.exp(-bce)
        return jnp.mean(focal_alpha * (1.0 - pt) ** focal_gamma * bce)

    y = head(params["U_w"], params["final_w"], params["final_b"])
    yc = head(params["U_ccs_w"], params["final_ccs_w"], params["final_ccs_b"])
    return y, yc, focal_loss(y, target), focal_loss(yc, target_ccs)


def init_params(key, *, input_size, Y, Y_ccs):
    ks = jax.random.split(key, 6)

    def xavier(k, shape):
        fan_out, fan_in = shape
        bound = jnp.sqrt(6.0 / (fan_in + fan_out))
        return jax.random.uniform(k, shape, jnp.float32, -bound, bound)

    return {
        "U_w":         xavier(ks[0], (Y, input_size)),
        "U_ccs_w":     xavier(ks[1], (Y_ccs, input_size)),
        "final_w":     xavier(ks[2], (Y, input_size)),
        "final_ccs_w": xavier(ks[3], (Y_ccs, input_size)),
        "final_b":     0.01 * jax.random.normal(ks[4], (Y,), jnp.float32),
        "final_ccs_b": 0.01 * jax.random.normal(ks[5], (Y_ccs,), jnp.float32),
    }


if __name__ == "__main__":
    # Small shapes consistent with the module: batch=2, seq=16, input_size=32,
    # Y=8 labels, Y_ccs=12 CCS labels.
    B, L, Fdim, Y, Yc = 2, 16, 32, 8, 12

    key = jax.random.PRNGKey(0)
    kx, kt, ktc, kp = jax.random.split(key, 4)

    params = init_params(kp, input_size=Fdim, Y=Y, Y_ccs=Yc)
    x = jax.random.normal(kx, (B, L, Fdim), jnp.float32)
    target = jax.random.bernoulli(kt, 0.5, (B, Y)).astype(jnp.float32)
    target_ccs = jax.random.bernoulli(ktc, 0.5, (B, Yc)).astype(jnp.float32)

    y, y_ccs, loss, loss_ccs = output_layer_mtl_forward(
        x, target, target_ccs, params, focal_alpha=1.0, focal_gamma=2)
    jax.block_until_ready((y, y_ccs, loss, loss_ccs))

    assert y.shape == (B, Y) and y_ccs.shape == (B, Yc)
    assert loss.shape == () and loss_ccs.shape == ()

    # Loose tolerance: the kernel feeds the MXU bf16 operands (f32 accumulation)
    # and uses an EUP-approximate reciprocal in the softmax.
    yr, ycr, lr, lcr = reference_forward(x, target, target_ccs, params,
                                         focal_alpha=1.0, focal_gamma=2)
    assert jnp.allclose(y, yr, atol=2e-1, rtol=1e-1)
    assert jnp.allclose(y_ccs, ycr, atol=2e-1, rtol=1e-1)
    assert jnp.allclose(loss, lr, atol=5e-2)
    assert jnp.allclose(loss_ccs, lcr, atol=5e-2)

    print("KERNEL_OK")
</pallas_src>

<mosaic_0001>
module attributes {stable_mosaic.version = 11 : i64} {
  func.func @_mtl_kernel(%arg0: i32, %arg1: memref<32x32xbf16, #tpu.memory_space<vmem>>, %arg2: memref<32x512xbf16, #tpu.memory_space<vmem>>, %arg3: memref<1x256xf32, #tpu.memory_space<vmem>>, %arg4: memref<2x256xf32, #tpu.memory_space<vmem>>, %arg5: memref<2x512xf32, #tpu.memory_space<vmem>>) attributes {dimension_semantics = [#tpu.dimension_semantics<parallel>], iteration_bounds = array<i64: 1>, scalar_prefetch = 0 : i64, scratch_operands = 0 : i64, tpu.core_type = #tpu.core_type<tc>, window_params = [{transform_indices = @transform_0, window_bounds = array<i64: 32, 32>}, {pipeline_mode = #tpu.pipeline_mode<synchronous>, transform_indices = @transform_1, window_bounds = array<i64: 32, 512>}, {pipeline_mode = #tpu.pipeline_mode<synchronous>, transform_indices = @transform_2, window_bounds = array<i64: 1, 256>}, {transform_indices = @transform_3, window_bounds = array<i64: 2, 256>}, {transform_indices = @transform_4, window_bounds = array<i64: 2, 512>}]} {
    %c0 = arith.constant 0 : index
    %c0_0 = arith.constant 0 : index
    %0 = vector.load %arg1[%c0, %c0_0] : memref<32x32xbf16, #tpu.memory_space<vmem>>, vector<32x32xbf16>
    %c0_1 = arith.constant 0 : index
    %c0_2 = arith.constant 0 : index
    %1 = vector.load %arg2[%c0_1, %c0_2] : memref<32x512xbf16, #tpu.memory_space<vmem>>, vector<32x512xbf16>
    %cst = arith.constant dense<0.000000e+00> : vector<32x512xf32>
    %2 = tpu.matmul %0, %1, %cst {dimension_numbers = #tpu.dot_dimension_numbers<[1], [0], [0], [1], [0, 0, 1, 1], [], []>} : vector<32x32xbf16>, vector<32x512xbf16>, vector<32x512xf32> -> vector<32x512xf32>
    %3 = vector.shape_cast %2 : vector<32x512xf32> to vector<2x16x512xf32>
    %4 = vector.extract_strided_slice %3 {offsets = [0, 0, 0], sizes = [2, 16, 256], strides = [1, 1, 1]} : vector<2x16x512xf32> to vector<2x16x256xf32>
    %5 = vector.extract_strided_slice %3 {offsets = [0, 0, 256], sizes = [2, 16, 256], strides = [1, 1, 1]} : vector<2x16x512xf32> to vector<2x16x256xf32>
    %cst_3 = arith.constant dense<0xFF800000> : vector<2x256xf32>
    %6 = vector.multi_reduction <maximumf>, %4, %cst_3 [1] : vector<2x16x256xf32> to vector<2x256xf32>
    %7 = vector.shape_cast %6 : vector<2x256xf32> to vector<2x1x256xf32>
    %8 = vector.broadcast %7 : vector<2x1x256xf32> to vector<2x16x256xf32>
    %9 = arith.subf %4, %8 : vector<2x16x256xf32>
    %10 = math.exp %9 : vector<2x16x256xf32>
    %cst_4 = arith.constant dense<0.000000e+00> : vector<2x256xf32>
    %11 = vector.multi_reduction <add>, %10, %cst_4 [1] : vector<2x16x256xf32> to vector<2x256xf32>
    %12 = vector.shape_cast %11 : vector<2x256xf32> to vector<2x1x256xf32>
    %13 = tpu.reciprocal %12 {approx = true} : vector<2x1x256xf32> -> vector<2x1x256xf32>
    %14 = vector.broadcast %13 : vector<2x1x256xf32> to vector<2x16x256xf32>
    %15 = arith.mulf %10, %14 : vector<2x16x256xf32>
    %16 = arith.mulf %15, %5 : vector<2x16x256xf32>
    %cst_5 = arith.constant dense<0.000000e+00> : vector<2x256xf32>
    %17 = vector.multi_reduction <add>, %16, %cst_5 [1] : vector<2x16x256xf32> to vector<2x256xf32>
    %c0_6 = arith.constant 0 : index
    %c0_7 = arith.constant 0 : index
    %18 = vector.load %arg3[%c0_6, %c0_7] : memref<1x256xf32, #tpu.memory_space<vmem>>, vector<1x256xf32>
    %19 = vector.broadcast %18 : vector<1x256xf32> to vector<2x256xf32>
    %20 = arith.addf %17, %19 : vector<2x256xf32>
    %c0_8 = arith.constant 0 : index
    %c0_9 = arith.constant 0 : index
    %21 = vector.load %arg4[%c0_8, %c0_9] : memref<2x256xf32, #tpu.memory_space<vmem>>, vector<2x256xf32>
    %cst_10 = arith.constant 0.000000e+00 : f32
    %22 = vector.broadcast %cst_10 : f32 to vector<2x256xf32>
    %23 = arith.maximumf %20, %22 : vector<2x256xf32>
    %24 = arith.mulf %20, %21 : vector<2x256xf32>
    %25 = arith.subf %23, %24 : vector<2x256xf32>
    %26 = math.absf %20 : vector<2x256xf32>
    %cst_11 = arith.constant 0.000000e+00 : f32
    %27 = vector.broadcast %cst_11 : f32 to vector<2x256xf32>
    %28 = arith.subf %27, %26 : vector<2x256xf32>
    %29 = math.exp %28 : vector<2x256xf32>
    %30 = math.log1p %29 : vector<2x256xf32>
    %31 = arith.addf %25, %30 : vector<2x256xf32>
    %cst_12 = arith.constant 0.000000e+00 : f32
    %32 = vector.broadcast %cst_12 : f32 to vector<2x256xf32>
    %33 = arith.subf %32, %31 : vector<2x256xf32>
    %34 = math.exp %33 : vector<2x256xf32>
    %cst_13 = arith.constant 1.000000e+00 : f32
    %35 = vector.broadcast %cst_13 : f32 to vector<2x256xf32>
    %36 = arith.subf %35, %34 : vector<2x256xf32>
    %cst_14 = arith.constant 1.000000e+00 : f32
    %37 = vector.broadcast %cst_14 : f32 to vector<2x256xf32>
    %38 = arith.mulf %37, %36 : vector<2x256xf32>
    %39 = arith.mulf %38, %36 : vector<2x256xf32>
    %cst_15 = arith.constant 1.000000e+00 : f32
    %40 = vector.broadcast %cst_15 : f32 to vector<2x256xf32>
    %41 = arith.mulf %40, %39 : vector<2x256xf32>
    %42 = arith.mulf %41, %31 : vector<2x256xf32>
    %c0_16 = arith.constant 0 : index
    %c0_17 = arith.constant 0 : index
    %43 = vector.load %arg5[%c0_16, %c0_17] : memref<2x512xf32, #tpu.memory_space<vmem>>, vector<2x256xf32>
    tpu.vector_store %arg5[%c0_16, %c0_17], %20 {strides = array<i32>} : memref<2x512xf32, #tpu.memory_space<vmem>>, vector<2x256xf32>,
    %c0_18 = arith.constant 0 : index
    %c256 = arith.constant 256 : index
    %44 = vector.load %arg5[%c0_18, %c256] : memref<2x512xf32, #tpu.memory_space<vmem>>, vector<2x256xf32>
    tpu.vector_store %arg5[%c0_18, %c256], %42 {strides = array<i32>} : memref<2x512xf32, #tpu.memory_space<vmem>>, vector<2x256xf32>,
    return
  }
  func.func @transform_0(%arg0: i32) -> (i32, i32) {
    %c0_i32 = arith.constant 0 : i32
    %c0_i32_0 = arith.constant 0 : i32
    return %arg0, %c0_i32 : i32, i32
  }
  func.func @transform_1(%arg0: i32) -> (i32, i32) {
    %c0_i32 = arith.constant 0 : i32
    %c0_i32_0 = arith.constant 0 : i32
    %c0_i32_1 = arith.constant 0 : i32
    return %c0_i32, %c0_i32_0 : i32, i32
  }
  func.func @transform_2(%arg0: i32) -> (i32, i32) {
    %c0_i32 = arith.constant 0 : i32
    %c0_i32_0 = arith.constant 0 : i32
    %c0_i32_1 = arith.constant 0 : i32
    return %c0_i32, %c0_i32_0 : i32, i32
  }
  func.func @transform_3(%arg0: i32) -> (i32, i32) {
    %c0_i32 = arith.constant 0 : i32
    %c0_i32_0 = arith.constant 0 : i32
    return %arg0, %c0_i32 : i32, i32
  }
  func.func @transform_4(%arg0: i32) -> (i32, i32) {
    %c0_i32 = arith.constant 0 : i32
    %c0_i32_0 = arith.constant 0 : i32
    return %arg0, %c0_i32 : i32, i32
  }
}

</mosaic_0001>

<bundles_post_ra>
// kernel: tpu_custom_call.1
= control target key start
LH: loop header
LB: loop body
LE: loop exit
PB: predicated region body
PF: predicated region fallthrough
CT: control target
= control target key end

     0   :  { %9 = vsyncpa [#allocation3], 0  ;;  %s850_s0 = inlined_call_operand.hbm [shape: bf16[32,32], index: 0, kind: input, shape index: {}]   ;;  %s851_s1 = inlined_call_operand.hbm [shape: bf16[32,512], index: 1, kind: input, shape index: {}]   ;;  %s852_s2 = inlined_call_operand.vmem [shape: f32[1,256], index: 2, kind: input, shape index: {}]   ;;  %s853_s3 = inlined_call_operand.vmem [shape: f32[2,256], index: 3, kind: input, shape index: {}]   ;;  %s854_s4 = inlined_call_operand.hbm [shape: f32[2,512], index: 4, kind: output, shape index: {}]  }
   0x1   :  { %10 = vsyncpa [#allocation6], 0 }
   0x2   :  { %11 = vsyncpa [#allocation4], 0  ;;  %s712_s15 = smov [#allocation2]   ;;  %s640_s19 = scalar_lea.hbm %s850_s0, 256 }
   0x3   :  { %s17_s16 = sshll.u32 %s712_s15, 4  ;;  %p641_p0 = scmp.ne.s32.totalorder %s850_s0, %s640_s19  ;;  %s18_s16 = int_to_ptr.vmem [resolvable:$true] %s17_s16 }
   0x4   :  { %p644_p1 = scmp.lt.u32.totalorder %s640_s19, %s850_s0 }
   0x6   :  { %p646_p2 = pnand %p644_p1, %p641_p0 }
   0x8   :  { %649 = shalt.err (!%p646_p2)
}
   0x9   :  { %s650_s24 = scalar_lea.vmem %s18_s16, 256  ;;  %p655_p4 = scmp.lt.s32.totalorder %s18_s16, %s18_s16 }
   0xa   :  { %p651_p3 = scmp.ne.s32.totalorder %s18_s16, %s650_s24  ;;  %p656_p5 = scmp.lt.s32.totalorder %s650_s24, %s650_s24 }
   0xc   :  { %p657_p6 = por %p656_p5, %p655_p4 }
   0xe   :  { %p658_p7 = pnand %p657_p6, %p651_p3 }
  0x10   :  { %661 = shalt.err (!%p658_p7)
}
  0x11   :  { %s713_s25 = smov 64   ;;  %s714_s26 = smov 4  }
  0x12   :  { %23 = dma.hbm_to_vmem [thread:$0]  %s850_s0, 256, %s18_s16, [#allocation3], %s713_s25, %s713_s25, %s714_s26  }
  0x13   :  { %s715_s29 = smov [#allocation5]   ;;  %s662_s7 = scalar_lea.hbm %s851_s1, 1024 }
  0x14   :  { %s29_s30 = sshll.u32 %s715_s29, 4  ;;  %p663_p8 = scmp.ne.s32.totalorder %s851_s1, %s662_s7  ;;  %s30_s30 = int_to_ptr.vmem [resolvable:$true] %s29_s30 }
  0x15   :  { %p666_p9 = scmp.lt.u32.totalorder %s662_s7, %s851_s1 }
  0x17   :  { %p668_p10 = pnand %p666_p9, %p663_p8 }
  0x19   :  { %671 = shalt.err (!%p668_p10)
}
  0x1a   :  { %s672_s12 = scalar_lea.vmem %s30_s30, 1024  ;;  %p677_p12 = scmp.lt.s32.totalorder %s30_s30, %s30_s30 }
  0x1b   :  { %p673_p11 = scmp.ne.s32.totalorder %s30_s30, %s672_s12  ;;  %p678_p13 = scmp.lt.s32.totalorder %s672_s12, %s672_s12 }
  0x1d   :  { %p679_p0 = por %p678_p13, %p677_p12 }
  0x1f   :  { %p680_p1 = pnand %p679_p0, %p673_p11 }
  0x21   :  { %683 = shalt.err (!%p680_p1)
}
  0x22   :  { %s716_s0 = smov 256   ;;  %s717_s13 = smov 16  }
  0x23   :  { %35 = dma.hbm_to_vmem [thread:$0]  %s851_s1, 1024, %s30_s30, [#allocation6], %s716_s0, %s716_s0, %s717_s13  }
  0x24   :  { %706 = dma.done.wait [#allocation3], 256  }
  0x25   :  { %707 = vsyncadd [#allocation3], 4294967040 }
  0x26   :  { %708 = dma.done.wait [#allocation6], 1024  }
  0x27   :  { %709 = vsyncadd [#allocation6], 4294966272  ;;  %v718_v0 = vmov 0   ;;  %v578_v1 = vld [vmem:[#allocation5 + $0x4] ss:$16 sps:$4 sm:$0xff]   ;;  %vm109_vm0 = vcmask 261120  }
  0x28   :  { %148 = vmatprep.mubr.bf16.mxu0 %v718_v0  ;;  %201 = vmatprep.mubr.bf16.mxu1 %v718_v0  ;;  %v580_v2 = vld [vmem:[#allocation5] ss:$16 sps:$4 sm:$0xff]   ;;  %v581_v3 = vld [vmem:[#allocation5 + $0x24] ss:$16 sps:$4 sm:$0xff]   ;;  %v586_v6 = vld [vmem:[#allocation5 + $0xc] ss:$16 sps:$4 sm:$0xff]  }
  0x29   :  { %116 = vmatprep.subr.bf16.mxu0 %v578_v1  ;;  %v583_v4 = vld [vmem:[#allocation5 + $0x20] ss:$16 sps:$4 sm:$0xff]   ;;  %v588_v7 = vld [vmem:[#allocation5 + $0x8] ss:$16 sps:$4 sm:$0xff]   ;;  %v589_v8 = vld [vmem:[#allocation5 + $0x2c] ss:$16 sps:$4 sm:$0xff]   ;;  %169 = vmatprep.subr.bf16.mxu1 %v586_v6 }
  0x2a   :  { %117 = vmatpush1.bf16.msra.mxu0 %v580_v2  ;;  %v584_v5 = vld [vmem:[#allocation2] sm:$0xff]   ;;  %170 = vmatpush1.bf16.msra.mxu1 %v588_v7  ;;  %v591_v9 = vld [vmem:[#allocation5 + $0x28] ss:$16 sps:$4 sm:$0xff]   ;;  %vm499_vm1 = vcmask 1041409   ;;  %vm501_vm2 = vcmask 1043459   ;;  %vm503_vm3 = vcmask 1045509  }
  0x2b   :  { %118 = vmatprep.subr.bf16.mxu0 %v581_v3  ;;  %171 = vmatprep.subr.bf16.mxu1 %v589_v8  ;;  %v585_v10 = vld [vmem:[#allocation2 + $0x8] sm:$0xff]   ;;  %vm505_vm4 = vcmask 1047559  }
  0x2e   :  { %119 = vmatpush1.bf16.msra.mxu0 %v583_v4  ;;  %172 = vmatpush1.bf16.msra.mxu1 %v591_v9 }
  0x31   :  { %564 = vmatmul.mubr.msk.bf16.vlgmr.msra.gmra.mrb[0].mxu0 %vm109_vm0, %v584_v5  ;;  %566 = vmatmul.mubr.msk.bf16.vlgmr.msra.gmra.mrb[0].mxu1 %vm109_vm0, %v584_v5 }
  0x32   :  { %158 = vmatprep.mubr.bf16.mxu0 %v718_v0  ;;  %211 = vmatprep.mubr.bf16.mxu1 %v718_v0 }
  0x39   :  { %565 = vmatmul.mubr.msk.bf16.gmra.mrb[4].mxu0 %vm109_vm0, %v585_v10  ;;  %567 = vmatmul.mubr.msk.bf16.gmra.mrb[4].mxu1 %vm109_vm0, %v585_v10 }
 0x104   :  { %v150_v11 = vpop.f32.mrb[0].mxu0  ;;  %v770_v18 = vpop.f32.mrb[0].mxu1 }
 0x105   :  { %v152_v12 = vpop.f32.mrb[1].mxu0  ;;  %v772_v20 = vpop.f32.mrb[1].mxu1 }
 0x106   :  { %v154_v13 = vpop.f32.mrb[2].mxu0  ;;  %v774_v22 = vpop.f32.mrb[2].mxu1 }
 0x107   :  { %v222_v14 = vmax.f32 %v150_v11, %v154_v13  ;;  %v156_v15 = vpop.f32.mrb[3].mxu0  ;;  %v776_v25 = vpop.f32.mrb[3].mxu1 }
 0x108   :  { %v229_v16 = vmax.f32 %v152_v12, %v156_v15 }
 0x109   :  { %v223_v17 = vrot.slane %v222_v14, 4 }
 0x10a   :  { %v230_v19 = vrot.slane %v229_v16, 4 }
 0x10b   :  { %v224_v21 = vmax.f32 %v222_v14, %v223_v17 }
 0x10c   :  { %v231_v23 = vmax.f32 %v229_v16, %v230_v19  ;;  %v160_v24 = vpop.f32.mrb[4].mxu0  ;;  %v778_v37 = vpop.f32.mrb[4].mxu1 }
 0x10d   :  { %v225_v26 = vrot.slane %v224_v21, 2  ;;  %v162_v27 = vpop.f32.mrb[5].mxu0  ;;  %v780_v40 = vpop.f32.mrb[5].mxu1 }
 0x10e   :  { %v232_v28 = vrot.slane %v231_v23, 2  ;;  %v164_v29 = vpop.f32.mrb[6].mxu0  ;;  %v782_v43 = vpop.f32.mrb[6].mxu1 }
 0x10f   :  { %v226_v30 = vmax.f32 %v224_v21, %v225_v26  ;;  %v236_v31 = vmax.f32 %v160_v24, %v164_v29  ;;  %v166_v32 = vpop.f32.mrb[7].mxu0  ;;  %v784_v46 = vpop.f32.mrb[7].mxu1 }
 0x110   :  { %v233_v33 = vmax.f32 %v231_v23, %v232_v28  ;;  %v243_v34 = vmax.f32 %v162_v27, %v166_v32 }
 0x111   :  { %v227_v35 = vrot.slane %v226_v30, 1  ;;  %v237_v36 = vrot.slane %v236_v31, 4 }
 0x112   :  { %v234_v38 = vrot.slane %v233_v33, 1  ;;  %v244_v39 = vrot.slane %v243_v34, 4 }
 0x113   :  { %v228_v41 = vmax.f32 %v226_v30, %v227_v35  ;;  %v238_v42 = vmax.f32 %v236_v31, %v237_v36 }
 0x114   :  { %v235_v44 = vmax.f32 %v233_v33, %v234_v38  ;;  %v245_v45 = vmax.f32 %v243_v34, %v244_v39 }
 0x115   :  { %v250_v47 = vsub.f32 %v150_v11, %v228_v41  ;;  %v252_v48 = vsub.f32 %v154_v13, %v228_v41  ;;  %v239_v49 = vrot.slane %v238_v42, 2 }
 0x116   :  { %v251_v50 = vsub.f32 %v152_v12, %v235_v44  ;;  %v253_v51 = vsub.f32 %v156_v15, %v235_v44  ;;  %v246_v52 = vrot.slane %v245_v45, 2 }
 0x117   :  { %v258_v53 = vmul.f32 1.442695, %v250_v47  ;;  %v262_v54 = vmul.f32 1.442695, %v252_v48  ;;  %v240_v55 = vmax.f32 %v238_v42, %v239_v49 }
 0x118   :  { %v260_v56 = vmul.f32 1.442695, %v251_v50  ;;  %v264_v57 = vmul.f32 1.442695, %v253_v51  ;;  %v247_v58 = vmax.f32 %v245_v45, %v246_v52 }
 0x119   :  { %592 = vpow2.f32 %v258_v53  ;;  %v241_v59 = vrot.slane %v240_v55, 1 }
 0x11a   :  { %594 = vpow2.f32 %v262_v54  ;;  %v248_v60 = vrot.slane %v247_v58, 1 }
 0x11b   :  { %596 = vpow2.f32 %v260_v56  ;;  %v242_v61 = vmax.f32 %v240_v55, %v241_v59  ;;  %v352_v55 = vlaneseq }
 0x11c   :  { %598 = vpow2.f32 %v264_v57  ;;  %v249_v62 = vmax.f32 %v247_v58, %v248_v60 }
 0x11d   :  { %v254_v63 = vsub.f32 %v160_v24, %v242_v61  ;;  %v256_v0 = vsub.f32 %v164_v29, %v242_v61 }
 0x11e   :  { %v255_v1 = vsub.f32 %v162_v27, %v249_v62  ;;  %v257_v2 = vsub.f32 %v166_v32, %v249_v62 }
 0x11f   :  { %v266_v3 = vmul.f32 1.442695, %v254_v63  ;;  %v270_v4 = vmul.f32 1.442695, %v256_v0  ;;  %v353_v63 = vshrl.u32 %v352_v55, 7 }
 0x120   :  { %v268_v5 = vmul.f32 1.442695, %v255_v1  ;;  %v272_v6 = vmul.f32 1.442695, %v257_v2 }
 0x121   :  { %600 = vpow2.f32 %v266_v3 }
 0x122   :  { %602 = vpow2.f32 %v270_v4 }
 0x123   :  { %v593_v7 = vpop.eup %592  ;;  %604 = vpow2.f32 %v268_v5 }
 0x124   :  { %v595_v8 = vpop.eup %594  ;;  %606 = vpow2.f32 %v272_v6 }
 0x125   :  { %v597_v9 = vpop.eup %596  ;;  %v274_v10 = vadd.f32 %v595_v8, %v593_v7 }
 0x126   :  { %v599_v11 = vpop.eup %598 }
 0x127   :  { %v275_v12 = vrot.slane %v274_v10, 4  ;;  %v281_v13 = vadd.f32 %v599_v11, %v597_v9 }
 0x129   :  { %v276_v14 = vadd.f32 %v275_v12, %v274_v10  ;;  %v282_v15 = vrot.slane %v281_v13, 4 }
 0x12b   :  { %v601_v16 = vpop.eup %600  ;;  %v277_v17 = vrot.slane %v276_v14, 2  ;;  %v283_v19 = vadd.f32 %v282_v15, %v281_v13 }
 0x12c   :  { %v603_v21 = vpop.eup %602 }
 0x12d   :  { %v605_v23 = vpop.eup %604  ;;  %v284_v24 = vrot.slane %v283_v19, 2  ;;  %v288_v26 = vadd.f32 %v603_v21, %v601_v16  ;;  %v278_v27 = vadd.f32 %v277_v17, %v276_v14  ;;  %v358_v14 = vsub.s32 1, %v353_v63 }
 0x12e   :  { %v607_v28 = vpop.eup %606 }
 0x12f   :  { %v289_v29 = vrot.slane %v288_v26, 4  ;;  %v295_v30 = vadd.f32 %v607_v28, %v605_v23  ;;  %v279_v31 = vrot.slane %v278_v27, 1  ;;  %v285_v32 = vadd.f32 %v284_v24, %v283_v19 }
 0x131   :  { %v290_v33 = vadd.f32 %v289_v29, %v288_v26  ;;  %v296_v34 = vrot.slane %v295_v30, 4  ;;  %v280_v35 = vadd.f32 %v279_v31, %v278_v27  ;;  %v286_v36 = vrot.slane %v285_v32, 1 }
 0x133   :  { %v291_v38 = vrot.slane %v290_v33, 2  ;;  %v297_v39 = vadd.f32 %v296_v34, %v295_v30  ;;  %608 = vrcp.f32 %v280_v35  ;;  %v287_v41 = vadd.f32 %v286_v36, %v285_v32 }
 0x135   :  { %v298_v42 = vrot.slane %v297_v39, 2  ;;  %610 = vrcp.f32 %v287_v41  ;;  %v292_v44 = vadd.f32 %v291_v38, %v290_v33 }
 0x137   :  { %v293_v45 = vrot.slane %v292_v44, 1  ;;  %v299_v47 = vadd.f32 %v298_v42, %v297_v39 }
 0x139   :  { %v294_v48 = vadd.f32 %v293_v45, %v292_v44  ;;  %v300_v49 = vrot.slane %v299_v47, 1  ;;  %v719_v45 = vmov 1983009808  }
 0x13b   :  { %612 = vrcp.f32 %v294_v48  ;;  %v301_v50 = vadd.f32 %v300_v49, %v299_v47  ;;  %v480_v47 = vunpack.c.l.s4 %v719_v45 }
 0x13d   :  { %v609_v51 = vpop.eup %608  ;;  %614 = vrcp.f32 %v301_v50 }
 0x13e   :  { %v306_v52 = vmul.f32 %v609_v51, %v593_v7  ;;  %v308_v53 = vmul.f32 %v609_v51, %v595_v8  ;;  %v354_v8 = vsub.s32 0, %v353_v63 }
 0x13f   :  { %v611_v54 = vpop.eup %610 }
 0x140   :  { %v314_v56 = vmul.f32 %v306_v52, %v770_v18  ;;  %v307_v57 = vmul.f32 %v611_v54, %v597_v9  ;;  %v316_v58 = vmul.f32 %v308_v53, %v774_v22  ;;  %v309_v59 = vmul.f32 %v611_v54, %v599_v11 }
 0x141   :  { %v481_v54 = vunpack.c.0.s8 %v480_v47 }
 0x142   :  { %v315_v60 = vmul.f32 %v307_v57, %v772_v20  ;;  %v322_v61 = vadd.f32 %v316_v58, %v314_v56  ;;  %v317_v62 = vmul.f32 %v309_v59, %v776_v25  ;;  %v350_v20 = vld [vmem:[%s852_s2] sm:$0x3] }
 0x143   :  { %v359_v29 = vrot.slane %v350_v20, %v358_v14  ;;  %v811_v59 = vsub.s32 %v481_v54, %v353_v63 }
 0x144   :  { %v323_v0 = vrot.slane %v322_v61, 4  ;;  %v329_v1 = vadd.f32 %v317_v62, %v315_v60 }
 0x145   :  { %v613_v2 = vpop.eup %612 }
 0x146   :  { %v324_v3 = vadd.f32 %v323_v0, %v322_v61  ;;  %v330_v4 = vrot.slane %v329_v1, 4  ;;  %v310_v5 = vmul.f32 %v613_v2, %v601_v16  ;;  %v312_v6 = vmul.f32 %v613_v2, %v603_v21 }
 0x147   :  { %v615_v7 = vpop.eup %614  ;;  %v355_v21 = vrot.slane %v350_v20, %v354_v8 }
 0x148   :  { %v325_v18 = vrot.slane %v324_v3, 2  ;;  %v331_v9 = vadd.f32 %v330_v4, %v329_v1  ;;  %v318_v22 = vmul.f32 %v310_v5, %v778_v37  ;;  %v311_v10 = vmul.f32 %v615_v7, %v605_v23 }
 0x149   :  { %v320_v25 = vmul.f32 %v312_v6, %v782_v43  ;;  %v313_v11 = vmul.f32 %v615_v7, %v607_v28 }
 0x14a   :  { %v326_v12 = vadd.f32 %v325_v18, %v324_v3  ;;  %v332_v13 = vrot.slane %v331_v9, 2  ;;  %v319_v15 = vmul.f32 %v311_v10, %v780_v40  ;;  %v568_v10 = vld.sshfl [vmem:[%s853_s3] sm:$0x33 pattern:$0x76325410]  ;;  %s720_s3 = smov [#allocation7]  }
 0x14b   :  { %v336_v16 = vadd.f32 %v320_v25, %v318_v22  ;;  %v321_v17 = vmul.f32 %v313_v11, %v784_v46  ;;  %v379_v11 = vcombine.high %v568_v10, %v568_v10  ;;  %s544_s18 = sshll.u32 %s720_s3, 4  ;;  %s545_s18 = int_to_ptr.vmem [resolvable:$true] %s544_s18 }
 0x14c   :  { %v327_v19 = vrot.slane %v326_v12, 1  ;;  %v333_v24 = vadd.f32 %v332_v13, %v331_v9  ;;  %s684_s19 = scalar_lea.vmem %s545_s18, 128  ;;  %p689_p3 = scmp.lt.s32.totalorder %s545_s18, %s545_s18 }
 0x14d   :  { %v337_v37 = vrot.slane %v336_v16, 4  ;;  %v343_v23 = vadd.f32 %v321_v17, %v319_v15  ;;  %p685_p2 = scmp.ne.s32.totalorder %s545_s18, %s684_s19  ;;  %p690_p4 = scmp.lt.s32.totalorder %s684_s19, %s684_s19 }
 0x14e   :  { %v328_v26 = vadd.f32 %v327_v19, %v326_v12  ;;  %v334_v27 = vrot.slane %v333_v24, 1 }
 0x14f   :  { %v338_v30 = vadd.f32 %v337_v37, %v336_v16  ;;  %v344_v31 = vrot.slane %v343_v23, 4  ;;  %p691_p5 = por %p690_p4, %p689_p3 }
 0x150   :  { %v797_v43 = vadd.f32 %v355_v21, %v328_v26  ;;  %v335_v28 = vadd.f32 %v334_v27, %v333_v24 }
 0x151   :  { %v339_v32 = vrot.slane %v338_v30, 2  ;;  %v345_v33 = vadd.f32 %v344_v31, %v343_v23  ;;  %p692_p6 = pnand %p691_p5, %p685_p2 }
 0x152   :  { %v394_v40 = vand.u32 2147483647, %v797_v43  ;;  %v800_v34 = vadd.f32 %v359_v29, %v335_v28  ;;  %v367_v14 = vmax.f32 %v797_v43, 0.0  ;;  %v386_v15 = vmul.f32 %v568_v10, %v797_v43 }
 0x153   :  { %v340_v46 = vadd.f32 %v339_v32, %v338_v30  ;;  %v346_v35 = vrot.slane %v345_v33, 2  ;;  %v380_v32 = vrot.slane %v568_v10, 1 }
 0x154   :  { %v398_v36 = vsub.f32 0.0, %v394_v40  ;;  %v395_v38 = vand.u32 2147483647, %v800_v34  ;;  %v478_v42 = vcombine.low %v797_v43, %v800_v34  ;;  %v387_v23 = vmul.f32 %v379_v11, %v800_v34 }
 0x155   :  { %v341_v39 = vrot.slane %v340_v46, 1  ;;  %v347_v41 = vadd.f32 %v346_v35, %v345_v33  ;;  %v390_v30 = vsub.f32 %v367_v14, %v386_v15 }
 0x156   :  { %v402_v44 = vmul.f32 1.442695, %v398_v36  ;;  %v399_v48 = vsub.f32 0.0, %v395_v38  ;;  %v485_v3 = vrot.slane %v478_v42, %v811_v59  ;;  %v381_v36 = vrot.slane %v379_v11, 1 }
 0x157   :  { %v342_v49 = vadd.f32 %v341_v39, %v340_v46  ;;  %v348_v50 = vrot.slane %v347_v41, 1 }
 0x158   :  { %616 = vpow2.f32 %v402_v44  ;;  %v404_v51 = vmul.f32 1.442695, %v399_v48 }
 0x159   :  { %v805_v52 = vadd.f32 %v355_v21, %v342_v49  ;;  %v349_v53 = vadd.f32 %v348_v50, %v347_v41  ;;  %v368_v21 = vmax.f32 %v800_v34, 0.0 }
 0x15a   :  { %618 = vpow2.f32 %v404_v51 }
 0x15b   :  { %v396_v55 = vand.u32 2147483647, %v805_v52  ;;  %v808_v56 = vadd.f32 %v359_v29, %v349_v53  ;;  %v391_v35 = vsub.f32 %v368_v21, %v387_v23  ;;  %v369_v42 = vmax.f32 %v805_v52, 0.0 }
 0x15c   :  { %v388_v44 = vmul.f32 %v380_v32, %v805_v52 }
 0x15d   :  { %v400_v57 = vsub.f32 0.0, %v396_v55  ;;  %v397_v58 = vand.u32 2147483647, %v808_v56  ;;  %v486_v60 = vcombine.low %v805_v52, %v808_v56  ;;  %v370_v50 = vmax.f32 %v808_v56, 0.0 }
 0x15e   :  { %v389_v51 = vmul.f32 %v381_v36, %v808_v56 }
 0x15f   :  { %v406_v61 = vmul.f32 1.442695, %v400_v57  ;;  %v401_v62 = vsub.f32 0.0, %v397_v58  ;;  %v493_v0 = vrot.slane %v486_v60, %v811_v59  ;;  %v392_v60 = vsub.f32 %v369_v42, %v388_v44 }
 0x161   :  { %620 = vpow2.f32 %v406_v61  ;;  %v408_v2 = vmul.f32 1.442695, %v401_v62  ;;  %v498_v4 = vrot.slane %v493_v0, 7 }
 0x162   :  { %v617_v1 = vpop.eup %616 }
 0x163   :  { %v410_v5 = vadd.f32 1.0, %v617_v1  ;;  %622 = vpow2.f32 %v408_v2  ;;  %v500_v63 = vsel %vm499_vm1, %v498_v4, %v485_v3  ;;  %v413_v22 = vmul.f32 -0.5, %v617_v1 }
 0x164   :  { %v619_v6 = vpop.eup %618  ;;  %v502_v7 = vsel %vm501_vm2, %v498_v4, %v500_v63  ;;  %v416_v16 = vand.u32 2147483647, %v617_v1  ;;  %v393_v3 = vsub.f32 %v370_v50, %v389_v51 }
 0x165   :  { %624 = vlog2.f32 %v410_v5  ;;  %v419_v8 = vadd.f32 1.0, %v619_v6  ;;  %v504_v18 = vsel %vm503_vm3, %v498_v4, %v502_v7  ;;  %v422_v25 = vmul.f32 -0.5, %v619_v6 }
 0x166   :  { %v506_v9 = vsel %vm505_vm4, %v498_v4, %v504_v18  ;;  %v414_v12 = vadd.f32 1.0, %v413_v22  ;;  %v425_v29 = vand.u32 2147483647, %v619_v6  ;;  %vm417_vm5 = vcmp.lt.f32.partialorder %v416_v16, 0.0004427343 }
 0x167   :  { %626 = vlog2.f32 %v419_v8  ;;  %508 = vst [vmem:[#allocation7] sm:$0xf] %v506_v9  ;;  %v423_v24 = vadd.f32 1.0, %v422_v25 }
 0x168   :  { %v415_v27 = vmul.f32 %v617_v1, %v414_v12  ;;  %vm426_vm6 = vcmp.lt.f32.partialorder %v425_v29, 0.0004427343 }
 0x169   :  { %v424_v40 = vmul.f32 %v619_v6, %v423_v24 }
 0x16b   :  { %v621_v20 = vpop.eup %620 }
 0x16c   :  { %v428_v13 = vadd.f32 1.0, %v621_v20  ;;  %v431_v31 = vmul.f32 -0.5, %v621_v20  ;;  %v434_v45 = vand.u32 2147483647, %v621_v20 }
 0x16d   :  { %v623_v17 = vpop.eup %622 }
 0x16e   :  { %628 = vlog2.f32 %v428_v13  ;;  %v437_v37 = vadd.f32 1.0, %v623_v17  ;;  %v440_v38 = vmul.f32 -0.5, %v623_v17  ;;  %v432_v41 = vadd.f32 1.0, %v431_v31 }
 0x16f   :  { %v625_v19 = vpop.eup %624  ;;  %v443_v58 = vand.u32 2147483647, %v623_v17  ;;  %vm435_vm7 = vcmp.lt.f32.partialorder %v434_v45, 0.0004427343 }
 0x170   :  { %v412_v26 = vmul.f32 0.6931472, %v625_v19  ;;  %630 = vlog2.f32 %v437_v37  ;;  %v441_v53 = vadd.f32 1.0, %v440_v38  ;;  %v433_v57 = vmul.f32 %v621_v20, %v432_v41 }
 0x171   :  { %v627_v28 = vpop.eup %626  ;;  %vm444_vm8 = vcmp.lt.f32.partialorder %v443_v58, 0.0004427343 }
 0x172   :  { %v418_v43 = vsel %vm417_vm5, %v415_v27, %v412_v26  ;;  %v421_v33 = vmul.f32 0.6931472, %v627_v28  ;;  %v442_v1 = vmul.f32 %v623_v17, %v441_v53 }
 0x173   :  { %v446_v46 = vadd.f32 %v418_v43, %v390_v30 }
 0x174   :  { %v427_v39 = vsel %vm426_vm6, %v424_v40, %v421_v33 }
 0x175   :  { %v450_v34 = vsub.f32 0.0, %v446_v46  ;;  %v447_v47 = vadd.f32 %v427_v39, %v391_v35 }
 0x177   :  { %v454_v48 = vmul.f32 1.442695, %v450_v34  ;;  %v451_v54 = vsub.f32 0.0, %v447_v47 }
 0x178   :  { %v629_v49 = vpop.eup %628 }
 0x179   :  { %v430_v55 = vmul.f32 0.6931472, %v629_v49  ;;  %632 = vpow2.f32 %v454_v48  ;;  %v456_v61 = vmul.f32 1.442695, %v451_v54 }
 0x17a   :  { %v631_v62 = vpop.eup %630 }
 0x17b   :  { %v436_v0 = vsel %vm435_vm7, %v433_v57, %v430_v55  ;;  %v439_v52 = vmul.f32 0.6931472, %v631_v62  ;;  %634 = vpow2.f32 %v456_v61 }
 0x17c   :  { %v448_v2 = vadd.f32 %v436_v0, %v392_v60 }
 0x17d   :  { %v445_v4 = vsel %vm444_vm8, %v442_v1, %v439_v52 }
 0x17e   :  { %v452_v5 = vsub.f32 0.0, %v448_v2  ;;  %v449_v56 = vadd.f32 %v445_v4, %v393_v3 }
 0x180   :  { %v458_v63 = vmul.f32 1.442695, %v452_v5  ;;  %v453_v6 = vsub.f32 0.0, %v449_v56 }
 0x182   :  { %636 = vpow2.f32 %v458_v63  ;;  %v460_v8 = vmul.f32 1.442695, %v453_v6 }
 0x183   :  { %v633_v7 = vpop.eup %632 }
 0x184   :  { %v462_v18 = vsub.f32 1.0, %v633_v7  ;;  %638 = vpow2.f32 %v460_v8 }
 0x185   :  { %v635_v9 = vpop.eup %634 }
 0x186   :  { %v466_v22 = vmul.f32 %v462_v18, %v462_v18  ;;  %v463_v10 = vsub.f32 1.0, %v635_v9 }
 0x188   :  { %v467_v20 = vmul.f32 %v463_v10, %v463_v10  ;;  %v470_v25 = vmul.f32 %v466_v22, %v446_v46 }
 0x18a   :  { %v471_v11 = vmul.f32 %v467_v20, %v447_v47 }
 0x18c   :  { %v637_v12 = vpop.eup %636  ;;  %v513_v14 = vcombine.low %v470_v25, %v471_v11 }
 0x18d   :  { %v464_v13 = vsub.f32 1.0, %v637_v12 }
 0x18e   :  { %v639_v15 = vpop.eup %638  ;;  %v520_v26 = vrot.slane %v513_v14, %v811_v59 }
 0x18f   :  { %v468_v16 = vmul.f32 %v464_v13, %v464_v13  ;;  %v465_v17 = vsub.f32 1.0, %v639_v15 }
 0x191   :  { %v469_v19 = vmul.f32 %v465_v17, %v465_v17  ;;  %v472_v21 = vmul.f32 %v468_v16, %v448_v2 }
 0x193   :  { %v473_v24 = vmul.f32 %v469_v19, %v449_v56 }
 0x195   :  { %v521_v37 = vcombine.low %v472_v21, %v473_v24 }
 0x197   :  { %v528_v23 = vrot.slane %v521_v37, %v811_v59 }
 0x199   :  { %v531_v27 = vrot.slane %v528_v23, 7 }
 0x19b   :  { %v532_v29 = vsel %vm499_vm1, %v531_v27, %v520_v26 }
 0x19c   :  { %v533_v30 = vsel %vm501_vm2, %v531_v27, %v532_v29 }
 0x19d   :  { %v534_v31 = vsel %vm503_vm3, %v531_v27, %v533_v30 }
 0x19e   :  { %v535_v28 = vsel %vm505_vm4, %v531_v27, %v534_v31 }
 0x19f   :  { %537 = vst [vmem:[#allocation7 + $0x4] sm:$0xf] %v535_v28 }
 0x1a0   :  { %695 = shalt.err (!%p692_p6)
}
 0x1a1   :  { %s696_s22 = scalar_lea.hbm %s854_s4, 128 }
 0x1a2   :  { %p697_p7 = scmp.ne.s32.totalorder %s854_s4, %s696_s22  ;;  %p700_p8 = scmp.lt.u32.totalorder %s696_s22, %s854_s4 }
 0x1a4   :  { %p702_p9 = pnand %p700_p8, %p697_p7 }
 0x1a6   :  { %705 = shalt.err (!%p702_p9)
}
 0x1a7   :  { %547 = dma.vmem_to_hbm [thread:$0]  %s545_s18, 128, %s854_s4, [#allocation4]  }
 0x1a8   :  { %710 = dma.done.wait [#allocation4], 128  }
 0x1a9   :  { %711 = vsyncadd [#allocation4], 4294967168 }
 0x1aa   :  { %551 = vsyncpa [#allocation3], 1 }
 0x1ab   :  { %552 = vsyncpa [#allocation6], 1 }
 0x1ac   :  { %553 = vsyncpa [#allocation4], 1 }

</bundles_post_ra>
